<compile_context>
chip_gen: v6e
topology: v6e:2x2x1
jax: 0.10.0
libtpu: 0.0.40
codegen_flags: <defaults>
</compile_context>

<pallas_src>
import jax
import jax.numpy as jnp
from jax.experimental import pallas as pl
from jax.experimental.pallas import tpu as pltpu


def _copy_kernel(x_ref, o_ref):
    # Pure pass-through: VMEM tile in -> VMEM tile out.
    o_ref[...] = x_ref[...]


_TARGET_BLOCK_BYTES = 8 * 1024 * 1024   # ~8 MiB per tile; 4 double-buffered tiles = 32 MiB
_VMEM_LIMIT_BYTES = 48 << 20            # above v5e/v7x default scoped VMEM, below physical
_MAX_TILE_COLS = 2048                   # lane-dense column cap (multiple of 128)


def _sublane_align(dtype) -> int:
    """Row alignment so non-final blocks stay sublane-packed (unmasked vst)."""
    itemsize = jnp.dtype(dtype).itemsize
    if itemsize >= 4:
        return 8
    if itemsize == 2:
        return 16
    return 32


def _materialized_copy(x: jax.Array) -> jax.Array:
    """Explicit HBM->HBM copy of x via a Pallas kernel (one read + one write)."""
    # TODO(synk): sub-byte dtypes (int4/fp4) are not tiled here; use the default
    # `return x` path for those.
    orig_shape = x.shape
    dtype = x.dtype
    n = x.size
    if n == 0:
        return x
    itemsize = jnp.dtype(dtype).itemsize

    # 2-D view on the ORIGINAL trailing dim — a pure metadata reshape, no pad,
    # no post-slice, so HBM traffic stays at exactly read(N) + write(N).
    if x.ndim >= 2:
        cols = orig_shape[-1]
        rows = n // cols
    else:
        cols = n
        rows = 1
    x2 = x.reshape(rows, cols)

    # Column tiling: multiple of 128 (lane-dense, unmasked vst) when possible;
    # a ragged final block is masked by Pallas.  For cols < 128 the full-extent
    # block is the only legal (and correct) choice.
    if cols >= 128:
        tile_cols = min((cols // 128) * 128, _MAX_TILE_COLS)
    else:
        tile_cols = cols

    # Row tiling: dtype-aware sublane alignment, targeting ~8 MiB blocks.
    align = _sublane_align(dtype)
    rows_per_block = max(1, _TARGET_BLOCK_BYTES // max(1, tile_cols * itemsize))
    if rows_per_block >= rows:
        tile_rows = rows                              # full extent is always legal
    else:
        tile_rows = max(align, (rows_per_block // align) * align)

    grid = (pl.cdiv(rows, tile_rows), pl.cdiv(cols, tile_cols))

    out2 = pl.pallas_call(
        _copy_kernel,
        out_shape=jax.ShapeDtypeStruct((rows, cols), dtype),
        grid_spec=pltpu.PrefetchScalarGridSpec(
            num_scalar_prefetch=0,
            grid=grid,
            in_specs=[pl.BlockSpec((tile_rows, tile_cols), lambda i, j: (i, j))],
            out_specs=pl.BlockSpec((tile_rows, tile_cols), lambda i, j: (i, j)),
        ),
        # Pure memory traffic hint for the XLA scheduler.
        cost_estimate=pl.CostEstimate(
            flops=0, transcendentals=0, bytes_accessed=2 * n * itemsize),
        compiler_params=pltpu.CompilerParams(
            # Independent output tiles -> both axes shardable across v7x's 2 TCs.
            dimension_semantics=("parallel", "parallel"),
            vmem_limit_bytes=_VMEM_LIMIT_BYTES,
        ),
    )(x2)

    return out2.reshape(orig_shape)


def identity(x: jax.Array, materialize: bool = False) -> jax.Array:
    """Pallas implementation of Identity.forward.

    Default: `return x` — the op costs nothing (no kernel, no HBM traffic).
    `materialize=True`: produce a fresh copy via the Pallas kernel above.
    """
    if not materialize:
        return x
    return _materialized_copy(x)


if __name__ == "__main__":
    key = jax.random.PRNGKey(0)
    # Small NCHW input consistent with a typical conv-feature module.
    x = jax.random.normal(key, (2, 4, 16, 16), dtype=jnp.float32)

    # Default (optimal) path: no kernel at all.
    y = identity(x)
    jax.block_until_ready(y)
    assert y.shape == x.shape and y.dtype == x.dtype
    assert bool(jnp.all(y == x))

    # Materialized-copy path: exercises the Pallas kernel.
    y2 = identity(x, materialize=True)
    jax.block_until_ready(y2)
    assert y2.shape == x.shape and y2.dtype == x.dtype
    assert bool(jnp.all(y2 == x))

    print("KERNEL_OK")
</pallas_src>

<mosaic_0001>
module attributes {stable_mosaic.version = 11 : i64} {
  func.func @_copy_kernel(%arg0: i32, %arg1: i32, %arg2: memref<128x16xf32, #tpu.memory_space<vmem>>, %arg3: memref<128x16xf32, #tpu.memory_space<vmem>>) attributes {dimension_semantics = [#tpu.dimension_semantics<parallel>, #tpu.dimension_semantics<parallel>], iteration_bounds = array<i64: 1, 1>, scalar_prefetch = 0 : i64, scratch_operands = 0 : i64, tpu.core_type = #tpu.core_type<tc>, window_params = [{transform_indices = @transform_0, window_bounds = array<i64: 128, 16>}, {transform_indices = @transform_1, window_bounds = array<i64: 128, 16>}]} {
    %c0 = arith.constant 0 : index
    %c0_0 = arith.constant 0 : index
    %0 = vector.load %arg2[%c0, %c0_0] : memref<128x16xf32, #tpu.memory_space<vmem>>, vector<128x16xf32>
    %c0_1 = arith.constant 0 : index
    %c0_2 = arith.constant 0 : index
    %1 = vector.load %arg3[%c0_1, %c0_2] : memref<128x16xf32, #tpu.memory_space<vmem>>, vector<128x16xf32>
    tpu.vector_store %arg3[%c0_1, %c0_2], %0 {strides = array<i32>} : memref<128x16xf32, #tpu.memory_space<vmem>>, vector<128x16xf32>,
    return
  }
  func.func @transform_0(%arg0: i32, %arg1: i32) -> (i32, i32) {
    %c0_i32 = arith.constant 0 : i32
    return %arg0, %arg1 : i32, i32
  }
  func.func @transform_1(%arg0: i32, %arg1: i32) -> (i32, i32) {
    %c0_i32 = arith.constant 0 : i32
    return %arg0, %arg1 : i32, i32
  }
}

</mosaic_0001>

<bundles_post_ra>
// kernel: tpu_custom_call.1
= control target key start
LH: loop header
LB: loop body
LE: loop exit
PB: predicated region body
PF: predicated region fallthrough
CT: control target
= control target key end

     0   :  { %vm24_vm0 = vcmask 130048   ;;  %s167_s0 = inlined_call_operand.vmem [shape: f32[128,16], index: 0, kind: input, shape index: {}]   ;;  %s168_s1 = inlined_call_operand.vmem [shape: f32[128,16], index: 1, kind: output, shape index: {}]  }
   0x1   :  { %v8_v0 = vld [vmem:[%s167_s0] sm:$0xff]  ;;  %v9_v1 = vld [vmem:[%s167_s0 + $0x8] sm:$0xff]  ;;  %v10_v2 = vld [vmem:[%s167_s0 + $0x10] sm:$0xff] }
   0x2   :  { %25 = vst.msk [vmem:[%s168_s1] sm:$0xff] %vm24_vm0, %v8_v0  ;;  %26 = vst.msk [vmem:[%s168_s1 + $0x8] sm:$0xff] %vm24_vm0, %v9_v1  ;;  %v11_v3 = vld [vmem:[%s167_s0 + $0x18] sm:$0xff]  ;;  %v12_v4 = vld [vmem:[%s167_s0 + $0x20] sm:$0xff] }
   0x3   :  { %27 = vst.msk [vmem:[%s168_s1 + $0x10] sm:$0xff] %vm24_vm0, %v10_v2  ;;  %v13_v5 = vld [vmem:[%s167_s0 + $0x28] sm:$0xff]  ;;  %28 = vst.msk [vmem:[%s168_s1 + $0x18] sm:$0xff] %vm24_vm0, %v11_v3  ;;  %v14_v6 = vld [vmem:[%s167_s0 + $0x30] sm:$0xff] }
   0x4   :  { %29 = vst.msk [vmem:[%s168_s1 + $0x20] sm:$0xff] %vm24_vm0, %v12_v4  ;;  %30 = vst.msk [vmem:[%s168_s1 + $0x28] sm:$0xff] %vm24_vm0, %v13_v5  ;;  %v15_v7 = vld [vmem:[%s167_s0 + $0x38] sm:$0xff]  ;;  %v16_v8 = vld [vmem:[%s167_s0 + $0x40] sm:$0xff] }
   0x5   :  { %31 = vst.msk [vmem:[%s168_s1 + $0x30] sm:$0xff] %vm24_vm0, %v14_v6  ;;  %32 = vst.msk [vmem:[%s168_s1 + $0x38] sm:$0xff] %vm24_vm0, %v15_v7  ;;  %v17_v9 = vld [vmem:[%s167_s0 + $0x48] sm:$0xff]  ;;  %v18_v10 = vld [vmem:[%s167_s0 + $0x50] sm:$0xff] }
   0x6   :  { %33 = vst.msk [vmem:[%s168_s1 + $0x40] sm:$0xff] %vm24_vm0, %v16_v8  ;;  %v19_v11 = vld [vmem:[%s167_s0 + $0x58] sm:$0xff]  ;;  %34 = vst.msk [vmem:[%s168_s1 + $0x48] sm:$0xff] %vm24_vm0, %v17_v9  ;;  %v20_v12 = vld [vmem:[%s167_s0 + $0x60] sm:$0xff] }
   0x7   :  { %35 = vst.msk [vmem:[%s168_s1 + $0x50] sm:$0xff] %vm24_vm0, %v18_v10  ;;  %36 = vst.msk [vmem:[%s168_s1 + $0x58] sm:$0xff] %vm24_vm0, %v19_v11  ;;  %v21_v13 = vld [vmem:[%s167_s0 + $0x68] sm:$0xff]  ;;  %v22_v14 = vld [vmem:[%s167_s0 + $0x70] sm:$0xff] }
   0x8   :  { %37 = vst.msk [vmem:[%s168_s1 + $0x60] sm:$0xff] %vm24_vm0, %v20_v12  ;;  %38 = vst.msk [vmem:[%s168_s1 + $0x68] sm:$0xff] %vm24_vm0, %v21_v13  ;;  %v23_v15 = vld [vmem:[%s167_s0 + $0x78] sm:$0xff] }
   0x9   :  { %39 = vst.msk [vmem:[%s168_s1 + $0x70] sm:$0xff] %vm24_vm0, %v22_v14  ;;  %40 = vst.msk [vmem:[%s168_s1 + $0x78] sm:$0xff] %vm24_vm0, %v23_v15 }

</bundles_post_ra>
